<compile_context>
chip_gen: v7x
topology: tpu7x:2x2x1
jax: 0.10.0
libtpu: 0.0.40
codegen_flags: <defaults>
</compile_context>

<pallas_src>
import functools
import math

import jax
import jax.numpy as jnp
from jax.experimental import pallas as pl
from jax.experimental.pallas import tpu as pltpu

HIDDEN = 256
OUT_PAD = 128          # lane-dense output width; only column 0 is the real q
_SUBLANE = 8


def _round_up(n, m):
    return ((n + m - 1) // m) * m


def qnetwork_kernel(x_ref, a_ref, w1x_ref, w1a_ref, b1_ref,
                    w2_ref, b2_ref, w3_ref, b3_ref, o_ref):
    # fc1 (contraction split over the obs / act halves of W1) + bias + relu
    h1 = jnp.dot(x_ref[...], w1x_ref[...], preferred_element_type=jnp.float32)
    h1 = h1 + jnp.dot(a_ref[...], w1a_ref[...],
                      preferred_element_type=jnp.float32)
    h1 = jnp.maximum(h1 + b1_ref[...], 0.0)
    # fc2 + bias + relu (cast back to the matmul dtype only for the MXU input)
    h2 = jnp.dot(h1.astype(w2_ref.dtype), w2_ref[...],
                 preferred_element_type=jnp.float32)
    h2 = jnp.maximum(h2 + b2_ref[...], 0.0)
    # fc3: W3 is zero-padded to (HIDDEN, OUT_PAD) -> lane-dense (TILE_B, 128)
    # output instead of an N=1 matmul + masked 1-lane stores.
    q = jnp.dot(h2.astype(w3_ref.dtype), w3_ref[...],
                preferred_element_type=jnp.float32)
    o_ref[...] = q + b3_ref[0, 0]


def init_params(key, obs_dim, act_dim):
    """PyTorch-style Linear init, weights stored as (in_features, out_features)."""
    in_dim = obs_dim + act_dim
    ks = jax.random.split(key, 6)

    def lin(kw, kb, fan_in, fan_out):
        bound = 1.0 / math.sqrt(fan_in)
        w = jax.random.uniform(kw, (fan_in, fan_out), jnp.float32, -bound, bound)
        b = jax.random.uniform(kb, (fan_out,), jnp.float32, -bound, bound)
        return w, b

    w1, b1 = lin(ks[0], ks[1], in_dim, HIDDEN)
    w2, b2 = lin(ks[2], ks[3], HIDDEN, HIDDEN)
    w3, b3 = lin(ks[4], ks[5], HIDDEN, 1)
    return (w1, b1, w2, b2, w3, b3)


def prepare_params(params, obs_dim, act_dim, matmul_dtype=jnp.float32):
    """One-time prep of kernel-ready params.

    - W1 is split into its obs / act row blocks (zero-padded to a multiple of
      8 rows) so the kernel never multiplies a 128-padded concat.
    - W3 is zero-padded to (HIDDEN, OUT_PAD) for a lane-dense output.
    - Matmul operands may be cast to bf16 (v6e/v7x); biases stay f32.
    """
    w1, b1, w2, b2, w3, b3 = params
    obs_pad = _round_up(obs_dim, _SUBLANE)
    act_pad = _round_up(act_dim, _SUBLANE)
    w1x = jnp.zeros((obs_pad, HIDDEN), jnp.float32).at[:obs_dim].set(w1[:obs_dim])
    w1a = jnp.zeros((act_pad, HIDDEN), jnp.float32).at[:act_dim].set(w1[obs_dim:])
    w3p = jnp.zeros((HIDDEN, OUT_PAD), jnp.float32).at[:, :1].set(w3)
    return dict(
        w1x=w1x.astype(matmul_dtype),
        w1a=w1a.astype(matmul_dtype),
        b1=b1.reshape(1, HIDDEN).astype(jnp.float32),
        w2=w2.astype(matmul_dtype),
        b2=b2.reshape(1, HIDDEN).astype(jnp.float32),
        w3=w3p.astype(matmul_dtype),
        b3=b3.reshape(1, 1).astype(jnp.float32),
    )


@functools.partial(jax.jit, static_argnames=("tile_b",))
def qnetwork_forward(x, a, kparams, *, tile_b=256):
    """x: (B, obs_dim), a: (B, act_dim) -> q: (B, 1).

    tile_b: batch tile per grid step. 256 feeds the 256x256 MXU on v6e/v7x;
    use 128 on v5e (4x 128x128 MXU, single vector-store slot).
    """
    B, obs_dim = x.shape
    act_dim = a.shape[1]
    obs_pad = kparams["w1x"].shape[0]
    act_pad = kparams["w1a"].shape[0]
    mm_dtype = kparams["w1x"].dtype

    # Batch tile: multiple of 8, capped by tile_b; don't scale with total batch.
    tb = min(tile_b, _round_up(B, _SUBLANE))
    b_pad = _round_up(B, tb)
    grid = (b_pad // tb,)

    # Only tiny pads (batch to the tile, features to the next multiple of 8);
    # no concatenated (B, 128) activation round-trips through HBM.
    x_p = jnp.pad(x.astype(mm_dtype), ((0, b_pad - B), (0, obs_pad - obs_dim)))
    a_p = jnp.pad(a.astype(mm_dtype), ((0, b_pad - B), (0, act_pad - act_dim)))

    fixed = lambda i: (0, 0)      # weights/biases: same block every step (resident)
    batched = lambda i: (i, 0)    # activations/output: walk the batch

    flops = 2 * b_pad * (obs_pad * HIDDEN + act_pad * HIDDEN
                         + HIDDEN * HIDDEN + HIDDEN * OUT_PAD)
    bytes_accessed = (
        x_p.size * x_p.dtype.itemsize + a_p.size * a_p.dtype.itemsize
        + sum(v.size * v.dtype.itemsize for v in kparams.values())
        + b_pad * OUT_PAD * 4)

    out = pl.pallas_call(
        qnetwork_kernel,
        out_shape=jax.ShapeDtypeStruct((b_pad, OUT_PAD), jnp.float32),
        grid=grid,
        in_specs=[
            pl.BlockSpec((tb, obs_pad), batched),          # x
            pl.BlockSpec((tb, act_pad), batched),          # a
            pl.BlockSpec((obs_pad, HIDDEN), fixed),        # W1 (obs rows)
            pl.BlockSpec((act_pad, HIDDEN), fixed),        # W1 (act rows)
            pl.BlockSpec((1, HIDDEN), fixed),              # b1
            pl.BlockSpec((HIDDEN, HIDDEN), fixed),         # W2
            pl.BlockSpec((1, HIDDEN), fixed),              # b2
            pl.BlockSpec((HIDDEN, OUT_PAD), fixed),        # W3 (padded)
            pl.BlockSpec(memory_space=pltpu.MemorySpace.SMEM),  # b3 scalar
        ],
        out_specs=pl.BlockSpec((tb, OUT_PAD), batched),
        compiler_params=pltpu.CompilerParams(
            dimension_semantics=("parallel",)),
        cost_estimate=pl.CostEstimate(
            flops=flops, transcendentals=0, bytes_accessed=bytes_accessed),
    )(x_p, a_p, kparams["w1x"], kparams["w1a"], kparams["b1"],
      kparams["w2"], kparams["b2"], kparams["w3"], kparams["b3"])

    return out[:B, :1]


def qnetwork_ref(x, a, params):
    w1, b1, w2, b2, w3, b3 = params
    xa = jnp.concatenate([x, a], axis=1)
    h1 = jnp.maximum(xa @ w1 + b1, 0.0)
    h2 = jnp.maximum(h1 @ w2 + b2, 0.0)
    return h2 @ w3 + b3


if __name__ == "__main__":
    key = jax.random.PRNGKey(0)
    k_p, k_x, k_a, k_x2, k_a2 = jax.random.split(key, 5)

    obs_dim, act_dim = 8, 3   # small ClassicControl-style shapes
    params = init_params(k_p, obs_dim, act_dim)

    # --- small batch, f32 matmul path: exact check vs. the JAX reference ---
    B = 8
    x = jax.random.normal(k_x, (B, obs_dim), jnp.float32)
    a = jax.random.normal(k_a, (B, act_dim), jnp.float32)
    kp_f32 = prepare_params(params, obs_dim, act_dim, jnp.float32)
    q = jax.block_until_ready(qnetwork_forward(x, a, kp_f32))
    q_ref = jax.block_until_ready(qnetwork_ref(x, a, params))
    assert q.shape == (B, 1)
    assert jnp.allclose(q, q_ref, atol=1e-4, rtol=1e-4), (q, q_ref)

    # --- larger batch (exercises grid of 2 tiles + batch padding) with bf16
    #     matmul inputs (the v6e/v7x-recommended path), looser tolerance ---
    B2 = 384
    x2 = jax.random.normal(k_x2, (B2, obs_dim), jnp.float32)
    a2 = jax.random.normal(k_a2, (B2, act_dim), jnp.float32)
    kp_bf16 = prepare_params(params, obs_dim, act_dim, jnp.bfloat16)
    q2 = jax.block_until_ready(qnetwork_forward(x2, a2, kp_bf16, tile_b=256))
    q2_ref = jax.block_until_ready(qnetwork_ref(x2, a2, params))
    assert q2.shape == (B2, 1)
    assert jnp.allclose(q2, q2_ref, atol=5e-2, rtol=5e-2)

    print("KERNEL_OK")
</pallas_src>

<mosaic_0001>
module attributes {stable_mosaic.version = 11 : i64} {
  func.func @qnetwork_kernel(%arg0: i32, %arg1: memref<8x8xf32, #tpu.memory_space<vmem>>, %arg2: memref<8x8xf32, #tpu.memory_space<vmem>>, %arg3: memref<8x256xf32, #tpu.memory_space<vmem>>, %arg4: memref<8x256xf32, #tpu.memory_space<vmem>>, %arg5: memref<1x256xf32, #tpu.memory_space<vmem>>, %arg6: memref<256x256xf32, #tpu.memory_space<vmem>>, %arg7: memref<1x256xf32, #tpu.memory_space<vmem>>, %arg8: memref<256x128xf32, #tpu.memory_space<vmem>>, %arg9: memref<1x1xf32, #tpu.memory_space<smem>>, %arg10: memref<8x128xf32, #tpu.memory_space<vmem>>) attributes {dimension_semantics = [#tpu.dimension_semantics<parallel>], iteration_bounds = array<i64: 1>, scalar_prefetch = 0 : i64, scratch_operands = 0 : i64, tpu.core_type = #tpu.core_type<tc>, window_params = [{transform_indices = @transform_0, window_bounds = array<i64: 8, 8>}, {transform_indices = @transform_1, window_bounds = array<i64: 8, 8>}, {pipeline_mode = #tpu.pipeline_mode<synchronous>, transform_indices = @transform_2, window_bounds = array<i64: 8, 256>}, {pipeline_mode = #tpu.pipeline_mode<synchronous>, transform_indices = @transform_3, window_bounds = array<i64: 8, 256>}, {pipeline_mode = #tpu.pipeline_mode<synchronous>, transform_indices = @transform_4, window_bounds = array<i64: 1, 256>}, {pipeline_mode = #tpu.pipeline_mode<synchronous>, transform_indices = @transform_5, window_bounds = array<i64: 256, 256>}, {pipeline_mode = #tpu.pipeline_mode<synchronous>, transform_indices = @transform_6, window_bounds = array<i64: 1, 256>}, {pipeline_mode = #tpu.pipeline_mode<synchronous>, transform_indices = @transform_7, window_bounds = array<i64: 256, 128>}, {transform_indices = @transform_8, window_bounds = array<i64: 1, 1>}, {transform_indices = @transform_9, window_bounds = array<i64: 8, 128>}]} {
    %c0 = arith.constant 0 : index
    %c0_0 = arith.constant 0 : index
    %0 = vector.load %arg1[%c0, %c0_0] : memref<8x8xf32, #tpu.memory_space<vmem>>, vector<8x8xf32>
    %c0_1 = arith.constant 0 : index
    %c0_2 = arith.constant 0 : index
    %1 = vector.load %arg3[%c0_1, %c0_2] : memref<8x256xf32, #tpu.memory_space<vmem>>, vector<8x256xf32>
    %cst = arith.constant dense<0.000000e+00> : vector<8x256xf32>
    %2 = tpu.matmul %0, %1, %cst {dimension_numbers = #tpu.dot_dimension_numbers<[1], [0], [0], [1], [0, 0, 1, 1], [], []>} : vector<8x8xf32>, vector<8x256xf32>, vector<8x256xf32> -> vector<8x256xf32>
    %c0_3 = arith.constant 0 : index
    %c0_4 = arith.constant 0 : index
    %3 = vector.load %arg2[%c0_3, %c0_4] : memref<8x8xf32, #tpu.memory_space<vmem>>, vector<8x8xf32>
    %c0_5 = arith.constant 0 : index
    %c0_6 = arith.constant 0 : index
    %4 = vector.load %arg4[%c0_5, %c0_6] : memref<8x256xf32, #tpu.memory_space<vmem>>, vector<8x256xf32>
    %cst_7 = arith.constant dense<0.000000e+00> : vector<8x256xf32>
    %5 = tpu.matmul %3, %4, %cst_7 {dimension_numbers = #tpu.dot_dimension_numbers<[1], [0], [0], [1], [0, 0, 1, 1], [], []>} : vector<8x8xf32>, vector<8x256xf32>, vector<8x256xf32> -> vector<8x256xf32>
    %6 = arith.addf %2, %5 : vector<8x256xf32>
    %c0_8 = arith.constant 0 : index
    %c0_9 = arith.constant 0 : index
    %7 = vector.load %arg5[%c0_8, %c0_9] : memref<1x256xf32, #tpu.memory_space<vmem>>, vector<1x256xf32>
    %8 = vector.broadcast %7 : vector<1x256xf32> to vector<8x256xf32>
    %9 = arith.addf %6, %8 : vector<8x256xf32>
    %cst_10 = arith.constant 0.000000e+00 : f32
    %10 = vector.broadcast %cst_10 : f32 to vector<8x256xf32>
    %11 = arith.maximumf %9, %10 : vector<8x256xf32>
    %c0_11 = arith.constant 0 : index
    %c0_12 = arith.constant 0 : index
    %12 = vector.load %arg6[%c0_11, %c0_12] : memref<256x256xf32, #tpu.memory_space<vmem>>, vector<256x256xf32>
    %cst_13 = arith.constant dense<0.000000e+00> : vector<8x256xf32>
    %13 = tpu.matmul %11, %12, %cst_13 {dimension_numbers = #tpu.dot_dimension_numbers<[1], [0], [0], [1], [0, 0, 1, 1], [], []>} : vector<8x256xf32>, vector<256x256xf32>, vector<8x256xf32> -> vector<8x256xf32>
    %c0_14 = arith.constant 0 : index
    %c0_15 = arith.constant 0 : index
    %14 = vector.load %arg7[%c0_14, %c0_15] : memref<1x256xf32, #tpu.memory_space<vmem>>, vector<1x256xf32>
    %15 = vector.broadcast %14 : vector<1x256xf32> to vector<8x256xf32>
    %16 = arith.addf %13, %15 : vector<8x256xf32>
    %cst_16 = arith.constant 0.000000e+00 : f32
    %17 = vector.broadcast %cst_16 : f32 to vector<8x256xf32>
    %18 = arith.maximumf %16, %17 : vector<8x256xf32>
    %c0_17 = arith.constant 0 : index
    %c0_18 = arith.constant 0 : index
    %19 = vector.load %arg8[%c0_17, %c0_18] : memref<256x128xf32, #tpu.memory_space<vmem>>, vector<256x128xf32>
    %cst_19 = arith.constant dense<0.000000e+00> : vector<8x128xf32>
    %20 = tpu.matmul %18, %19, %cst_19 {dimension_numbers = #tpu.dot_dimension_numbers<[1], [0], [0], [1], [0, 0, 1, 1], [], []>} : vector<8x256xf32>, vector<256x128xf32>, vector<8x128xf32> -> vector<8x128xf32>
    %c0_20 = arith.constant 0 : index
    %c0_21 = arith.constant 0 : index
    %21 = memref.load %arg9[%c0_20, %c0_21] : memref<1x1xf32, #tpu.memory_space<smem>>
    %22 = vector.broadcast %21 : f32 to vector<8x128xf32>
    %23 = arith.addf %20, %22 : vector<8x128xf32>
    %c0_22 = arith.constant 0 : index
    %c0_23 = arith.constant 0 : index
    %24 = vector.load %arg10[%c0_22, %c0_23] : memref<8x128xf32, #tpu.memory_space<vmem>>, vector<8x128xf32>
    tpu.vector_store %arg10[%c0_22, %c0_23], %23 {strides = array<i32>} : memref<8x128xf32, #tpu.memory_space<vmem>>, vector<8x128xf32>,
    return
  }
  func.func @transform_0(%arg0: i32) -> (i32, i32) {
    %c0_i32 = arith.constant 0 : i32
    %c0_i32_0 = arith.constant 0 : i32
    return %arg0, %c0_i32 : i32, i32
  }
  func.func @transform_1(%arg0: i32) -> (i32, i32) {
    %c0_i32 = arith.constant 0 : i32
    %c0_i32_0 = arith.constant 0 : i32
    return %arg0, %c0_i32 : i32, i32
  }
  func.func @transform_2(%arg0: i32) -> (i32, i32) {
    %c0_i32 = arith.constant 0 : i32
    %c0_i32_0 = arith.constant 0 : i32
    %c0_i32_1 = arith.constant 0 : i32
    return %c0_i32, %c0_i32_0 : i32, i32
  }
  func.func @transform_3(%arg0: i32) -> (i32, i32) {
    %c0_i32 = arith.constant 0 : i32
    %c0_i32_0 = arith.constant 0 : i32
    %c0_i32_1 = arith.constant 0 : i32
    return %c0_i32, %c0_i32_0 : i32, i32
  }
  func.func @transform_4(%arg0: i32) -> (i32, i32) {
    %c0_i32 = arith.constant 0 : i32
    %c0_i32_0 = arith.constant 0 : i32
    %c0_i32_1 = arith.constant 0 : i32
    return %c0_i32, %c0_i32_0 : i32, i32
  }
  func.func @transform_5(%arg0: i32) -> (i32, i32) {
    %c0_i32 = arith.constant 0 : i32
    %c0_i32_0 = arith.constant 0 : i32
    %c0_i32_1 = arith.constant 0 : i32
    return %c0_i32, %c0_i32_0 : i32, i32
  }
  func.func @transform_6(%arg0: i32) -> (i32, i32) {
    %c0_i32 = arith.constant 0 : i32
    %c0_i32_0 = arith.constant 0 : i32
    %c0_i32_1 = arith.constant 0 : i32
    return %c0_i32, %c0_i32_0 : i32, i32
  }
  func.func @transform_7(%arg0: i32) -> (i32, i32) {
    %c0_i32 = arith.constant 0 : i32
    %c0_i32_0 = arith.constant 0 : i32
    %c0_i32_1 = arith.constant 0 : i32
    return %c0_i32, %c0_i32_0 : i32, i32
  }
  func.func @transform_8(%arg0: i32) -> (i32, i32) {
    %c0_i32 = arith.constant 0 : i32
    %c0_i32_0 = arith.constant 0 : i32
    %c0_i32_1 = arith.constant 0 : i32
    return %c0_i32, %c0_i32_0 : i32, i32
  }
  func.func @transform_9(%arg0: i32) -> (i32, i32) {
    %c0_i32 = arith.constant 0 : i32
    %c0_i32_0 = arith.constant 0 : i32
    return %arg0, %c0_i32 : i32, i32
  }
}

</mosaic_0001>

<bundles_post_ra>
// kernel: qnetwork_forward.1
= control target key start
LH: loop header
LB: loop body
LE: loop exit
PB: predicated region body
PF: predicated region fallthrough
CT: control target
= control target key end

     0   :  { %15 = vsyncpa [#allocation4], 0  ;;  %s839_s0 = inlined_call_operand.hbm [shape: f32[8,8], index: 0, kind: input, shape index: {}]   ;;  %s840_s1 = inlined_call_operand.vmem [shape: f32[8,8], index: 1, kind: input, shape index: {}]   ;;  %s841_s2 = inlined_call_operand.vmem [shape: f32[8,256], index: 2, kind: input, shape index: {}]   ;;  %s842_s3 = inlined_call_operand.vmem [shape: f32[8,256], index: 3, kind: input, shape index: {}]   ;;  %s843_s4 = inlined_call_operand.vmem [shape: f32[1,256], index: 4, kind: input, shape index: {}]   ;;  %s844_s5 = inlined_call_operand.hbm [shape: f32[256,256], index: 5, kind: input, shape index: {}]   ;;  %s845_s6 = inlined_call_operand.vmem [shape: f32[1,256], index: 6, kind: input, shape index: {}]   ;;  %s846_s7 = inlined_call_operand.hbm [shape: f32[256,128], index: 7, kind: input, shape index: {}]   ;;  %s847_s8 = inlined_call_operand.<no memory space> [shape: f32[1,1], index: 8, kind: input, shape index: {}]   ;;  %s848_s9 = inlined_call_operand.vmem [shape: f32[8,128], index: 9, kind: output, shape index: {}]  }
   0x1   :  { %16 = vsyncpa [#allocation6], 0  ;;  %s716_s30 = smov [#allocation5]   ;;  %s646_s13 = scalar_lea.hbm %s844_s5, 8192 }
   0x2   :  { %s40_s10 = sshll.u32 %s716_s30, 4  ;;  %p647_p0 = scmp.ne.s32.totalorder %s844_s5, %s646_s13  ;;  %s41_s10 = int_to_ptr.vmem [resolvable:$true] %s40_s10 }
   0x3   :  { %p650_p1 = scmp.lt.u32.totalorder %s646_s13, %s844_s5 }
   0x5   :  { %p652_p2 = pnand %p650_p1, %p647_p0 }
   0x7   :  { %655 = shalt.err (!%p652_p2)
}
   0x8   :  { %s656_s18 = scalar_lea.vmem %s41_s10, 8192  ;;  %p661_p4 = scmp.lt.s32.totalorder %s41_s10, %s41_s10 }
   0x9   :  { %p657_p3 = scmp.ne.s32.totalorder %s41_s10, %s656_s18  ;;  %p662_p5 = scmp.lt.s32.totalorder %s656_s18, %s656_s18 }
   0xb   :  { %p663_p6 = por %p662_p5, %p661_p4 }
   0xd   :  { %p664_p7 = pnand %p663_p6, %p657_p3 }
   0xf   :  { %667 = shalt.err (!%p664_p7)
}
  0x10   :  { %s717_s19 = smov 256   ;;  %s718_s20 = smov 16  }
  0x11   :  { %46 = dma.hbm_to_vmem [thread:$0]  %s844_s5, 8192, %s41_s10, [#allocation6], %s717_s19, %s717_s19, %s718_s20  }
  0x12   :  { %s719_s23 = smov [#allocation3]   ;;  %s720_s25 = smov [#allocation7]  }
  0x13   :  { %s23_s24 = sshll.u32 %s719_s23, 4  ;;  %s54_s26 = sshll.u32 %s720_s25, 4  ;;  %s24_s24 = int_to_ptr.vmem [resolvable:$true] %s23_s24  ;;  %s55_s26 = int_to_ptr.vmem [resolvable:$true] %s54_s26 }
  0x14   :  { %s668_s29 = scalar_lea.hbm %s839_s0, 128 }
  0x15   :  { %p669_p8 = scmp.ne.s32.totalorder %s839_s0, %s668_s29  ;;  %p672_p9 = scmp.lt.u32.totalorder %s668_s29, %s839_s0 }
  0x17   :  { %p674_p10 = pnand %p672_p9, %p669_p8 }
  0x19   :  { %677 = shalt.err (!%p674_p10)
}
  0x1a   :  { %s678_s5 = scalar_lea.vmem %s24_s24, 128  ;;  %p683_p12 = scmp.lt.s32.totalorder %s24_s24, %s24_s24 }
  0x1b   :  { %p679_p11 = scmp.ne.s32.totalorder %s24_s24, %s678_s5  ;;  %p684_p13 = scmp.lt.s32.totalorder %s678_s5, %s678_s5 }
  0x1d   :  { %p685_p0 = por %p684_p13, %p683_p12 }
  0x1f   :  { %p686_p1 = pnand %p685_p0, %p679_p11 }
  0x21   :  { %689 = shalt.err (!%p686_p1)
}
  0x22   :  { %26 = dma.hbm_to_vmem [thread:$0]  %s839_s0, 128, %s24_s24, [#allocation4]  }
  0x23   :  { %s690_s17 = scalar_lea.hbm %s846_s7, 4096 }
  0x24   :  { %p691_p2 = scmp.ne.s32.totalorder %s846_s7, %s690_s17  ;;  %p694_p3 = scmp.lt.u32.totalorder %s690_s17, %s846_s7 }
  0x26   :  { %p696_p4 = pnand %p694_p3, %p691_p2 }
  0x28   :  { %699 = shalt.err (!%p696_p4)
}
  0x29   :  { %s700_s22 = scalar_lea.vmem %s55_s26, 4096  ;;  %p705_p6 = scmp.lt.s32.totalorder %s55_s26, %s55_s26 }
  0x2a   :  { %p701_p5 = scmp.ne.s32.totalorder %s55_s26, %s700_s22  ;;  %p706_p7 = scmp.lt.s32.totalorder %s700_s22, %s700_s22 }
  0x2c   :  { %p707_p8 = por %p706_p7, %p705_p6 }
  0x2e   :  { %p708_p9 = pnand %p707_p8, %p701_p5 }
  0x30   :  { %711 = shalt.err (!%p708_p9)
}
  0x31   :  { %s721_s0 = smov 128   ;;  %s722_s23 = smov 8  }
  0x32   :  { %60 = dma.hbm_to_vmem [thread:$0]  %s846_s7, 4096, %s55_s26, [#allocation6], %s721_s0, %s721_s0, %s722_s23  }
  0x33   :  { %712 = dma.done.wait [#allocation4], 128  }
  0x34   :  { %713 = vsyncadd [#allocation4], 4294967168 }
  0x35   :  { %714 = dma.done.wait [#allocation6], 12288  }
  0x36   :  { %715 = vsyncadd [#allocation6], 4294955008  ;;  %v723_v0 = vmov 0.0   ;;  %v77_v1 = vld [vmem:[%s842_s3 + $0x8] sm:$0xff]  ;;  %v76_v2 = vld [vmem:[%s842_s3] sm:$0xff]  ;;  %vm78_vm0 = vcmask 64512  }
  0x37   :  { %146 = vmatprep.mubr.f32.mxu0 %v723_v0  ;;  %v75_v3 = vld [vmem:[%s840_s1] sm:$0xff]  ;;  %82 = vmatprep.subr.mxu0 %v77_v1  ;;  %v74_v4 = vld [vmem:[%s841_s2 + $0x8] sm:$0xff]  ;;  %v244_v6 = vld [vmem:[#allocation5 + $0x8] sm:$0xff] }
  0x38   :  { %v73_v5 = vld [vmem:[%s841_s2] sm:$0xff]  ;;  %83 = vmatpush1.msra.mxu0 %v76_v2  ;;  %v243_v8 = vld [vmem:[#allocation5] sm:$0xff]  ;;  %v245_v10 = vld [vmem:[#allocation5 + $0x10] sm:$0xff] }
  0x39   :  { %v246_v7 = vld [vmem:[#allocation5 + $0x18] sm:$0xff]  ;;  %503 = vmatmul.mubr.msk.f32.vlgmr.msra.gmra.mrb[0].mxu0 %vm78_vm0, %v75_v3  ;;  %156 = vmatprep.subr.mxu0 %v74_v4  ;;  %v248_v11 = vld [vmem:[#allocation5 + $0x28] sm:$0xff]  ;;  %v542_v13 = vpack.c.bf16 %v245_v10, %v243_v8  ;;  %v247_v15 = vld [vmem:[#allocation5 + $0x20] sm:$0xff] }
  0x3a   :  { %v540_v9 = vpack.c.bf16 %v246_v7, %v244_v6  ;;  %v250_v12 = vld [vmem:[#allocation5 + $0x38] sm:$0xff]  ;;  %157 = vmatpush1.msra.mxu0 %v73_v5  ;;  %220 = vmatprep.mubr.f32.mxu0 %v723_v0  ;;  %v249_v16 = vld [vmem:[#allocation5 + $0x30] sm:$0xff]  ;;  %v252_v17 = vld [vmem:[#allocation5 + $0x48] sm:$0xff] }
  0x3b   :  { %v544_v14 = vpack.c.bf16 %v250_v12, %v248_v11  ;;  %v254_v18 = vld [vmem:[#allocation5 + $0x58] sm:$0xff]  ;;  %v546_v19 = vpack.c.bf16 %v249_v16, %v247_v15  ;;  %v251_v21 = vld [vmem:[#allocation5 + $0x40] sm:$0xff]  ;;  %v253_v22 = vld [vmem:[#allocation5 + $0x50] sm:$0xff] }
  0x3c   :  { %541 = vmatprep.subr.bf16.mxu1 %v540_v9  ;;  %v548_v20 = vpack.c.bf16 %v254_v18, %v252_v17  ;;  %v72_v23 = vld [vmem:[#allocation3] sm:$0xff]  ;;  %v256_v24 = vld [vmem:[#allocation5 + $0x68] sm:$0xff]  ;;  %v550_v26 = vpack.c.bf16 %v253_v22, %v251_v21  ;;  %v255_v28 = vld [vmem:[#allocation5 + $0x60] sm:$0xff] }
  0x3d   :  { %543 = vmatpush1.bf16.msra.mxu1 %v542_v13  ;;  %v258_v25 = vld [vmem:[#allocation5 + $0x78] sm:$0xff]  ;;  %v257_v29 = vld [vmem:[#allocation5 + $0x70] sm:$0xff]  ;;  %v260_v30 = vld [vmem:[#allocation5 + $0x88] sm:$0xff] }
  0x3e   :  { %545 = vmatprep.subr.bf16.mxu1 %v544_v14  ;;  %v552_v27 = vpack.c.bf16 %v258_v25, %v256_v24  ;;  %v262_v31 = vld [vmem:[#allocation5 + $0x98] sm:$0xff]  ;;  %v554_v32 = vpack.c.bf16 %v257_v29, %v255_v28  ;;  %v259_v34 = vld [vmem:[#allocation5 + $0x80] sm:$0xff]  ;;  %v261_v35 = vld [vmem:[#allocation5 + $0x90] sm:$0xff] }
  0x3f   :  { %v556_v33 = vpack.c.bf16 %v262_v31, %v260_v30  ;;  %v264_v36 = vld [vmem:[#allocation5 + $0xa8] sm:$0xff]  ;;  %v266_v37 = vld [vmem:[#allocation5 + $0xb8] sm:$0xff]  ;;  %v558_v38 = vpack.c.bf16 %v261_v35, %v259_v34  ;;  %v263_v40 = vld [vmem:[#allocation5 + $0xa0] sm:$0xff] }
  0x40   :  { %v560_v39 = vpack.c.bf16 %v266_v37, %v264_v36  ;;  %v265_v41 = vld [vmem:[#allocation5 + $0xb0] sm:$0xff]  ;;  %v268_v42 = vld [vmem:[#allocation5 + $0xc8] sm:$0xff]  ;;  %v270_v43 = vld [vmem:[#allocation5 + $0xd8] sm:$0xff] }
  0x41   :  { %547 = vmatpush1.bf16.msra.mxu1 %v546_v19  ;;  %504 = vmatmul.mubr.msk.f32.vlgmr.msra.gmra.mrb[0].mxu0 %vm78_vm0, %v72_v23  ;;  %v562_v44 = vpack.c.bf16 %v265_v41, %v263_v40  ;;  %v564_v45 = vpack.c.bf16 %v270_v43, %v268_v42  ;;  %v267_v46 = vld [vmem:[#allocation5 + $0xc0] sm:$0xff]  ;;  %v269_v47 = vld [vmem:[#allocation5 + $0xd0] sm:$0xff]  ;;  %v272_v48 = vld [vmem:[#allocation5 + $0xe8] sm:$0xff] }
  0x42   :  { %549 = vmatprep.subr.bf16.mxu1 %v548_v20  ;;  %v274_v49 = vld [vmem:[#allocation5 + $0xf8] sm:$0xff]  ;;  %v566_v50 = vpack.c.bf16 %v269_v47, %v267_v46  ;;  %v271_v52 = vld [vmem:[#allocation5 + $0xe0] sm:$0xff]  ;;  %v273_v53 = vld [vmem:[#allocation5 + $0xf0] sm:$0xff] }
  0x43   :  { %v568_v51 = vpack.c.bf16 %v274_v49, %v272_v48  ;;  %v276_v54 = vld [vmem:[#allocation5 + $0x108] sm:$0xff]  ;;  %v278_v55 = vld [vmem:[#allocation5 + $0x118] sm:$0xff]  ;;  %v570_v56 = vpack.c.bf16 %v273_v53, %v271_v52  ;;  %v275_v58 = vld [vmem:[#allocation5 + $0x100] sm:$0xff] }
  0x44   :  { %v572_v57 = vpack.c.bf16 %v278_v55, %v276_v54  ;;  %v277_v59 = vld [vmem:[#allocation5 + $0x110] sm:$0xff]  ;;  %v280_v60 = vld [vmem:[#allocation5 + $0x128] sm:$0xff]  ;;  %v282_v61 = vld [vmem:[#allocation5 + $0x138] sm:$0xff] }
  0x45   :  { %551 = vmatpush1.bf16.msra.mxu1 %v550_v26  ;;  %v574_v62 = vpack.c.bf16 %v277_v59, %v275_v58  ;;  %v576_v63 = vpack.c.bf16 %v282_v61, %v280_v60  ;;  %v279_v0 = vld [vmem:[#allocation5 + $0x120] sm:$0xff]  ;;  %v281_v1 = vld [vmem:[#allocation5 + $0x130] sm:$0xff]  ;;  %v284_v2 = vld [vmem:[#allocation5 + $0x148] sm:$0xff] }
  0x46   :  { %553 = vmatprep.subr.bf16.mxu1 %v552_v27  ;;  %v286_v3 = vld [vmem:[#allocation5 + $0x158] sm:$0xff]  ;;  %v578_v4 = vpack.c.bf16 %v281_v1, %v279_v0  ;;  %v283_v6 = vld [vmem:[#allocation5 + $0x140] sm:$0xff]  ;;  %v285_v7 = vld [vmem:[#allocation5 + $0x150] sm:$0xff] }
  0x47   :  { %v580_v5 = vpack.c.bf16 %v286_v3, %v284_v2  ;;  %v288_v8 = vld [vmem:[#allocation5 + $0x168] sm:$0xff]  ;;  %v290_v9 = vld [vmem:[#allocation5 + $0x178] sm:$0xff]  ;;  %v582_v10 = vpack.c.bf16 %v285_v7, %v283_v6  ;;  %v287_v12 = vld [vmem:[#allocation5 + $0x160] sm:$0xff] }
  0x48   :  { %v584_v11 = vpack.c.bf16 %v290_v9, %v288_v8  ;;  %v289_v13 = vld [vmem:[#allocation5 + $0x170] sm:$0xff]  ;;  %v292_v14 = vld [vmem:[#allocation5 + $0x188] sm:$0xff]  ;;  %v294_v15 = vld [vmem:[#allocation5 + $0x198] sm:$0xff] }
  0x49   :  { %555 = vmatpush1.bf16.msra.mxu1 %v554_v32  ;;  %v586_v16 = vpack.c.bf16 %v289_v13, %v287_v12  ;;  %v588_v17 = vpack.c.bf16 %v294_v15, %v292_v14  ;;  %v291_v18 = vld [vmem:[#allocation5 + $0x180] sm:$0xff]  ;;  %v293_v19 = vld [vmem:[#allocation5 + $0x190] sm:$0xff]  ;;  %v296_v20 = vld [vmem:[#allocation5 + $0x1a8] sm:$0xff]  ;;  %v229_v14 = vlaneseq }
  0x4a   :  { %557 = vmatprep.subr.bf16.mxu1 %v556_v33  ;;  %v298_v21 = vld [vmem:[#allocation5 + $0x1b8] sm:$0xff]  ;;  %v590_v22 = vpack.c.bf16 %v293_v19, %v291_v18  ;;  %v295_v24 = vld [vmem:[#allocation5 + $0x1a0] sm:$0xff]  ;;  %v297_v25 = vld [vmem:[#allocation5 + $0x1b0] sm:$0xff] }
  0x4b   :  { %v592_v23 = vpack.c.bf16 %v298_v21, %v296_v20  ;;  %v300_v26 = vld [vmem:[#allocation5 + $0x1c8] sm:$0xff]  ;;  %v302_v27 = vld [vmem:[#allocation5 + $0x1d8] sm:$0xff]  ;;  %v594_v28 = vpack.c.bf16 %v297_v25, %v295_v24  ;;  %v299_v30 = vld [vmem:[#allocation5 + $0x1c0] sm:$0xff]  ;;  %v230_v15 = vshrl.u32 %v229_v14, 7 }
  0x4c   :  { %v596_v29 = vpack.c.bf16 %v302_v27, %v300_v26  ;;  %v301_v31 = vld [vmem:[#allocation5 + $0x1d0] sm:$0xff]  ;;  %v304_v33 = vld [vmem:[#allocation5 + $0x1e8] sm:$0xff]  ;;  %v306_v34 = vld [vmem:[#allocation5 + $0x1f8] sm:$0xff] }
  0x4d   :  { %559 = vmatpush1.bf16.msra.mxu1 %v558_v38  ;;  %v598_v32 = vpack.c.bf16 %v301_v31, %v299_v30  ;;  %v600_v35 = vpack.c.bf16 %v306_v34, %v304_v33  ;;  %v303_v36 = vld [vmem:[#allocation5 + $0x1e0] sm:$0xff]  ;;  %v305_v37 = vld [vmem:[#allocation5 + $0x1f0] sm:$0xff]  ;;  %v409_v40 = vld [vmem:[#allocation7 + $0x88] sm:$0xff]  ;;  %v235_v18 = vsub.s32 1, %v230_v15 }
  0x4e   :  { %561 = vmatprep.subr.bf16.mxu1 %v560_v39  ;;  %v602_v38 = vpack.c.bf16 %v305_v37, %v303_v36  ;;  %v408_v39 = vld [vmem:[#allocation7 + $0x80] sm:$0xff]  ;;  %v393_v43 = vld [vmem:[#allocation7 + $0x8] sm:$0xff]  ;;  %v394_v48 = vld [vmem:[#allocation7 + $0x10] sm:$0xff] }
  0x4f   :  { %v392_v41 = vld [vmem:[#allocation7] sm:$0xff]  ;;  %v604_v42 = vpack.c.bf16 %v409_v40, %v408_v39  ;;  %v395_v49 = vld [vmem:[#allocation7 + $0x18] sm:$0xff]  ;;  %v397_v55 = vld [vmem:[#allocation7 + $0x28] sm:$0xff] }
  0x50   :  { %v606_v46 = vpack.c.bf16 %v393_v43, %v392_v41  ;;  %v610_v52 = vpack.c.bf16 %v395_v49, %v394_v48  ;;  %v396_v54 = vld [vmem:[#allocation7 + $0x20] sm:$0xff]  ;;  %v398_v60 = vld [vmem:[#allocation7 + $0x30] sm:$0xff]  ;;  %v399_v61 = vld [vmem:[#allocation7 + $0x38] sm:$0xff] }
  0x51   :  { %563 = vmatpush1.bf16.msra.mxu1 %v562_v44  ;;  %v410_v44 = vld [vmem:[#allocation7 + $0x90] sm:$0xff]  ;;  %605 = vmatprep.subr.bf16.mxu0 %v604_v42  ;;  %v614_v58 = vpack.c.bf16 %v397_v55, %v396_v54  ;;  %v618_v0 = vpack.c.bf16 %v399_v61, %v398_v60  ;;  %v400_v2 = vld [vmem:[#allocation7 + $0x40] sm:$0xff]  ;;  %v401_v3 = vld [vmem:[#allocation7 + $0x48] sm:$0xff] }
  0x52   :  { %565 = vmatprep.subr.bf16.mxu1 %v564_v45  ;;  %v411_v45 = vld [vmem:[#allocation7 + $0x98] sm:$0xff]  ;;  %607 = vmatpush3.bf16.msra.mxu0 %v606_v46  ;;  %v622_v6 = vpack.c.bf16 %v401_v3, %v400_v2  ;;  %v402_v8 = vld [vmem:[#allocation7 + $0x50] sm:$0xff]  ;;  %v404_v27 = vld [vmem:[#allocation7 + $0x60] sm:$0xff]  ;;  %v425_v46 = vstv %s847_s8 }
  0x53   :  { %v608_v47 = vpack.c.bf16 %v411_v45, %v410_v44  ;;  %v403_v9 = vld [vmem:[#allocation7 + $0x58] sm:$0xff]  ;;  %v422_v30 = vld [vmem:[#allocation7 + $0xf0] sm:$0xff] }
  0x54   :  { %v626_v12 = vpack.c.bf16 %v403_v9, %v402_v8  ;;  %v423_v31 = vld [vmem:[#allocation7 + $0xf8] sm:$0xff]  ;;  %v406_v33 = vld [vmem:[#allocation7 + $0x70] sm:$0xff] }
  0x55   :  { %567 = vmatpush1.bf16.msra.mxu1 %v566_v50  ;;  %v412_v50 = vld [vmem:[#allocation7 + $0xa0] sm:$0xff]  ;;  %609 = vmatprep.subr.bf16.mxu0 %v608_v47  ;;  %v407_v34 = vld [vmem:[#allocation7 + $0x78] sm:$0xff] }
  0x56   :  { %569 = vmatprep.subr.bf16.mxu1 %v568_v51  ;;  %v413_v51 = vld [vmem:[#allocation7 + $0xa8] sm:$0xff]  ;;  %611 = vmatpush3.bf16.msra.mxu0 %v610_v52  ;;  %v307_v36 = vld [vmem:[%s845_s6] sm:$0x3] }
  0x57   :  { %v612_v53 = vpack.c.bf16 %v413_v51, %v412_v50 }
  0x59   :  { %571 = vmatpush1.bf16.msra.mxu1 %v570_v56  ;;  %v414_v56 = vld [vmem:[#allocation7 + $0xb0] sm:$0xff]  ;;  %613 = vmatprep.subr.bf16.mxu0 %v612_v53 }
  0x5a   :  { %573 = vmatprep.subr.bf16.mxu1 %v572_v57  ;;  %v415_v57 = vld [vmem:[#allocation7 + $0xb8] sm:$0xff]  ;;  %615 = vmatpush3.bf16.msra.mxu0 %v614_v58 }
  0x5b   :  { %v616_v59 = vpack.c.bf16 %v415_v57, %v414_v56 }
  0x5d   :  { %575 = vmatpush1.bf16.msra.mxu1 %v574_v62  ;;  %v416_v62 = vld [vmem:[#allocation7 + $0xc0] sm:$0xff]  ;;  %617 = vmatprep.subr.bf16.mxu0 %v616_v59 }
  0x5e   :  { %577 = vmatprep.subr.bf16.mxu1 %v576_v63  ;;  %v417_v63 = vld [vmem:[#allocation7 + $0xc8] sm:$0xff]  ;;  %619 = vmatpush3.bf16.msra.mxu0 %v618_v0 }
  0x5f   :  { %v620_v1 = vpack.c.bf16 %v417_v63, %v416_v62 }
  0x61   :  { %579 = vmatpush1.bf16.msra.mxu1 %v578_v4  ;;  %v418_v4 = vld [vmem:[#allocation7 + $0xd0] sm:$0xff]  ;;  %621 = vmatprep.subr.bf16.mxu0 %v620_v1 }
  0x62   :  { %581 = vmatprep.subr.bf16.mxu1 %v580_v5  ;;  %v419_v5 = vld [vmem:[#allocation7 + $0xd8] sm:$0xff]  ;;  %623 = vmatpush3.bf16.msra.mxu0 %v622_v6 }
  0x63   :  { %v624_v7 = vpack.c.bf16 %v419_v5, %v418_v4 }
  0x65   :  { %583 = vmatpush1.bf16.msra.mxu1 %v582_v10  ;;  %v420_v10 = vld [vmem:[#allocation7 + $0xe0] sm:$0xff]  ;;  %625 = vmatprep.subr.bf16.mxu0 %v624_v7 }
  0x66   :  { %585 = vmatprep.subr.bf16.mxu1 %v584_v11  ;;  %v421_v11 = vld [vmem:[#allocation7 + $0xe8] sm:$0xff]  ;;  %627 = vmatpush3.bf16.msra.mxu0 %v626_v12 }
  0x67   :  { %v628_v13 = vpack.c.bf16 %v421_v11, %v420_v10 }
  0x69   :  { %587 = vmatpush1.bf16.msra.mxu1 %v586_v16  ;;  %629 = vmatprep.subr.bf16.mxu0 %v628_v13  ;;  %v231_v16 = vsub.s32 0, %v230_v15 }
  0x6a   :  { %589 = vmatprep.subr.bf16.mxu1 %v588_v17  ;;  %v227_v17 = vld [vmem:[%s843_s4] sm:$0x3] }
  0x6b   :  { %v232_v19 = vrot.slane %v227_v17, %v231_v16  ;;  %v236_v20 = vrot.slane %v227_v17, %v235_v18  ;;  %v312_v37 = vrot.slane %v307_v36, %v231_v16 }
  0x6d   :  { %591 = vmatpush1.bf16.msra.mxu1 %v590_v22 }
  0x6e   :  { %593 = vmatprep.subr.bf16.mxu1 %v592_v23 }
  0x71   :  { %595 = vmatpush1.bf16.msra.mxu1 %v594_v28  ;;  %v405_v28 = vld [vmem:[#allocation7 + $0x68] sm:$0xff] }
  0x72   :  { %597 = vmatprep.subr.bf16.mxu1 %v596_v29  ;;  %v630_v29 = vpack.c.bf16 %v405_v28, %v404_v27 }
  0x74   :  { %631 = vmatpush3.bf16.msra.mxu0 %v630_v29 }
  0x75   :  { %599 = vmatpush1.bf16.msra.mxu1 %v598_v32  ;;  %v632_v32 = vpack.c.bf16 %v423_v31, %v422_v30 }
  0x76   :  { %601 = vmatprep.subr.bf16.mxu1 %v600_v35  ;;  %v634_v35 = vpack.c.bf16 %v407_v34, %v406_v33 }
  0x77   :  { %633 = vmatprep.subr.bf16.mxu0 %v632_v32 }
  0x78   :  { %635 = vmatpush3.bf16.msra.mxu0 %v634_v35 }
  0x79   :  { %603 = vmatpush1.bf16.msra.mxu1 %v602_v38  ;;  %v316_v38 = vrot.slane %v307_v36, %v235_v18 }
 0x114   :  { %v222_v21 = vpop.f32.mrb[0].mxu0 }
 0x115   :  { %v239_v22 = vadd.f32 %v232_v19, %v222_v21  ;;  %v224_v23 = vpop.f32.mrb[1].mxu0 }
 0x116   :  { %v240_v24 = vadd.f32 %v236_v20, %v224_v23 }
 0x117   :  { %v241_v26 = vmax.f32 %v239_v22, 0.0 }
 0x118   :  { %v242_v25 = vmax.f32 %v240_v24, 0.0 }
 0x11a   :  { %383 = vmatprep.mubr.f32.mxu1 %v242_v25 }
 0x11b   :  { %384 = vmatmul.mubr.f32.vlgmr.msra.gmra.mrb[0].mxu1 %v241_v26 }
 0x1ee   :  { %v385_v39 = vpop.f32.mrb[0].mxu1 }
 0x1ef   :  { %v386_v40 = vadd.f32 %v385_v39, %v312_v37  ;;  %v387_v41 = vpop.f32.mrb[1].mxu1 }
 0x1f0   :  { %v388_v42 = vadd.f32 %v387_v41, %v316_v38 }
 0x1f1   :  { %v390_v44 = vmax.f32 %v386_v40, 0.0 }
 0x1f2   :  { %v391_v43 = vmax.f32 %v388_v42, 0.0 }
 0x1f4   :  { %490 = vmatprep.mubr.f32.mxu0 %v391_v43 }
 0x1f5   :  { %491 = vmatmul.mubr.f32.vlgmr.msra.gmra.mrb[2].mxu0 %v390_v44 }
 0x2c8   :  { %v537_v45 = vpop.f32.mrb[2].mxu0 }
 0x2c9   :  { %v538_v47 = vpop.f32.mrb[3].mxu0 }
 0x2ca   :  { %v539_v48 = vadd.f32 %v538_v47, %v537_v45 }
 0x2cc   :  { %v493_v49 = vadd.f32 %v539_v48, %v425_v46 }
 0x2ce   :  { %496 = vst [vmem:[%s848_s9] sm:$0xff] %v493_v49 }
 0x2cf   :  { %501 = vsyncpa [#allocation4], 1 }
 0x2d0   :  { %502 = vsyncpa [#allocation6], 1 }

</bundles_post_ra>
